<compile_context>
chip_gen: v6e
topology: v6e:2x2x1
jax: 0.10.0
libtpu: 0.0.40
codegen_flags: <defaults>
</compile_context>

<pallas_src>
import jax
import jax.numpy as jnp
from jax.experimental import pallas as pl
from jax.experimental.pallas import tpu as pltpu

_MIB = 1024 * 1024


def _round_up(x, m):
    return ((x + m - 1) // m) * m


def _rgcn_kernel(h_ref, nrep_ref, w_ref, b_ref, o_ref):
    """Fused epilogue: out = relu(node_repr + bias + h @ W), full-K MXU pass."""
    acc = jnp.dot(h_ref[...], w_ref[...], preferred_element_type=jnp.float32)
    out = nrep_ref[...].astype(jnp.float32) + b_ref[...].astype(jnp.float32) + acc
    o_ref[...] = jnp.maximum(out, 0.0).astype(o_ref.dtype)


def _query_tpu():
    """(physical VMEM bytes, TensorCores per chip) with safe fallbacks."""
    vmem_cap, num_cores = None, 1
    try:
        info = pltpu.get_tpu_info()
    except Exception:
        info = None
    if info is not None:
        vmem_cap = getattr(info, "vmem_capacity_bytes", None)
        for attr in ("num_cores", "tensorcores_per_chip", "num_tensorcores",
                     "cores_per_chip"):
            v = getattr(info, attr, None)
            try:
                v = int(v)
            except (TypeError, ValueError):
                continue
            if v > 1:
                num_cores = v
                break
    try:
        vmem_cap = int(vmem_cap)
    except (TypeError, ValueError):
        vmem_cap = 0
    if vmem_cap <= 0:
        vmem_cap = 64 * _MIB  # conservative (v7x-sized) fallback
    return vmem_cap, num_cores


def rgcn_layer_forward(h, node_repr, loop_weight, bias):
    """h: [N, in_feat], node_repr: [N, out_feat], loop_weight: [in_feat, out_feat],
    bias: [out_feat].  Returns relu(node_repr + bias + h @ loop_weight)."""
    N, K = h.shape
    K2, F = loop_weight.shape
    assert K == K2 and node_repr.shape == (N, F) and bias.shape == (F,)
    out_dtype = h.dtype
    eb = 4  # budget in f32 bytes (conservative for narrower dtypes)

    vmem_cap, num_cores = _query_tpu()
    vmem_limit = max(16 * _MIB, min(vmem_cap // 2, 96 * _MIB))
    tile_budget = int(vmem_limit * 0.8)

    def shrink8(t):
        nt = max(8, (t // 2) // 8 * 8)
        return nt if nt < t else max(8, t - 8)

    # ---- initial row tile ----------------------------------------------------
    tm_cap = 512
    if N <= tm_cap:
        tm = N  # full-dim block: exempt from the multiple-of-8 rule
        if num_cores >= 2 and N > 8 * num_cores:
            # Megacore (v7x): keep the parallel row axis splittable across TCs.
            tm = _round_up(pl.cdiv(N, num_cores), 8)
    else:
        tm = tm_cap
        if num_cores >= 2:
            n_tiles = pl.cdiv(N, tm)
            if n_tiles % num_cores:
                tm = _round_up(pl.cdiv(N, _round_up(n_tiles, num_cores)), 8)

    # ---- path A: single full-width column block (no padding anywhere) -------
    def need_full(tm_):
        per_step = tm_ * K + 2 * tm_ * F        # h, node_repr, out tiles
        resident = K * F + F                    # weight + bias (fetched once)
        return eb * 2 * (per_step + resident)   # x2: double buffering

    tm_a = tm
    while need_full(tm_a) > tile_budget and tm_a > 8:
        tm_a = shrink8(tm_a)

    if need_full(tm_a) <= tile_budget:
        tm = tm_a
        grid = (pl.cdiv(N, tm),)
        in_specs = [
            pl.BlockSpec((tm, K), lambda i: (i, 0)),   # h           (full K)
            pl.BlockSpec((tm, F), lambda i: (i, 0)),   # node_repr (post-propagate)
            pl.BlockSpec((K, F), lambda i: (0, 0)),    # loop_weight (VMEM-resident)
            pl.BlockSpec((1, F), lambda i: (0, 0)),    # bias        (VMEM-resident)
        ]
        out_specs = pl.BlockSpec((tm, F), lambda i: (i, 0))
        dim_sem = ("parallel",)
        bytes_accessed = eb * (N * K + K * F + 2 * N * F + F)
        need = need_full(tm)
    else:
        # ---- path B: wide-F / large-K fallback.  Column tiles live on the
        # SLOW grid axis so each weight column block is DMA'd exactly once.
        tn = F if F < 128 else min(512, (F // 128) * 128)
        tm_b = N if N <= tm_cap else tm_cap

        def need_tiled(tm_, tn_):
            per_step = tm_ * K + 2 * tm_ * tn_
            resident = K * tn_ + tn_
            return eb * 2 * (per_step + resident)

        while need_tiled(tm_b, tn) > tile_budget:
            if tm_b > 64:
                tm_b = shrink8(tm_b)
            elif tn > 128:
                tn = max(128, (tn // 2) // 128 * 128)
            elif tm_b > 8:
                tm_b = shrink8(tm_b)
            else:
                # TODO(synk): extreme in_feat would need a K-reduction grid axis
                # (f32 accumulator scratch + pl.when init/finalize + zero-padded K).
                break

        tm = tm_b
        n_j = pl.cdiv(F, tn)
        grid = (n_j, pl.cdiv(N, tm))          # (slow: columns, fast: rows)
        in_specs = [
            pl.BlockSpec((tm, K), lambda j, i: (i, 0)),
            pl.BlockSpec((tm, tn), lambda j, i: (i, j)),
            pl.BlockSpec((K, tn), lambda j, i: (0, j)),
            pl.BlockSpec((1, tn), lambda j, i: (0, j)),
        ]
        out_specs = pl.BlockSpec((tm, tn), lambda j, i: (i, j))
        dim_sem = ("parallel", "parallel")
        bytes_accessed = eb * (n_j * N * K + K * F + 2 * N * F + F)
        need = need_tiled(tm, tn)

    vmem_limit = int(min(vmem_cap, max(vmem_limit, need + 4 * _MIB)))

    cost = pl.CostEstimate(
        flops=2 * N * K * F,
        transcendentals=0,
        bytes_accessed=int(bytes_accessed),
    )

    return pl.pallas_call(
        _rgcn_kernel,
        out_shape=jax.ShapeDtypeStruct((N, F), out_dtype),
        grid_spec=pltpu.PrefetchScalarGridSpec(
            num_scalar_prefetch=0,
            grid=grid,
            in_specs=in_specs,
            out_specs=out_specs,
        ),
        compiler_params=pltpu.CompilerParams(
            dimension_semantics=dim_sem,
            vmem_limit_bytes=vmem_limit,
        ),
        cost_estimate=cost,
    )(h, node_repr, loop_weight, bias.reshape(1, F))


def rgcn_layer_reference(h, node_repr, loop_weight, bias):
    loop_message = h @ loop_weight
    out = node_repr + bias + loop_message
    return jnp.maximum(out, 0.0)


if __name__ == "__main__":
    key = jax.random.PRNGKey(0)
    k_h, k_w, k_b = jax.random.split(key, 3)

    N = 192          # number of graph nodes
    in_feat = 96     # K (not a multiple of 128 -> full-K block, exempt)
    out_feat = 160   # F (full-width column block, no padding required)

    # Deterministic xavier-uniform-style initialization (ReLU gain = sqrt(2)).
    gain = jnp.sqrt(2.0)
    w_bound = gain * jnp.sqrt(6.0 / (in_feat + out_feat))
    loop_weight = jax.random.uniform(
        k_w, (in_feat, out_feat), jnp.float32, -w_bound, w_bound
    )
    b_bound = gain * jnp.sqrt(6.0 / (1 + out_feat))
    bias = jax.random.uniform(k_b, (out_feat,), jnp.float32, -b_bound, b_bound)

    # Node features g.ndata['h'].
    h = jax.random.normal(k_h, (N, in_feat), jnp.float32)
    # propagate() is abstract in the base class -> post-propagation node
    # representation is supplied explicitly (stand-in tensor of width out_feat).
    node_repr = jax.random.normal(jax.random.PRNGKey(1), (N, out_feat), jnp.float32)

    out = rgcn_layer_forward(h, node_repr, loop_weight, bias)
    out = jax.block_until_ready(out)

    ref = rgcn_layer_reference(h, node_repr, loop_weight, bias)
    assert out.shape == (N, out_feat)
    assert jnp.allclose(out, ref, atol=1e-4, rtol=1e-4), "mismatch vs reference"

    print("KERNEL_OK")
</pallas_src>

<mosaic_0001>
module attributes {stable_mosaic.version = 11 : i64} {
  func.func @_rgcn_kernel(%arg0: i32, %arg1: memref<192x96xf32, #tpu.memory_space<vmem>>, %arg2: memref<192x160xf32, #tpu.memory_space<vmem>>, %arg3: memref<96x160xf32, #tpu.memory_space<vmem>>, %arg4: memref<1x160xf32, #tpu.memory_space<vmem>>, %arg5: memref<192x160xf32, #tpu.memory_space<vmem>>) attributes {dimension_semantics = [#tpu.dimension_semantics<parallel>], iteration_bounds = array<i64: 1>, scalar_prefetch = 0 : i64, scratch_operands = 0 : i64, tpu.core_type = #tpu.core_type<tc>, window_params = [{transform_indices = @transform_0, window_bounds = array<i64: 192, 96>}, {transform_indices = @transform_1, window_bounds = array<i64: 192, 160>}, {pipeline_mode = #tpu.pipeline_mode<synchronous>, transform_indices = @transform_2, window_bounds = array<i64: 96, 160>}, {pipeline_mode = #tpu.pipeline_mode<synchronous>, transform_indices = @transform_3, window_bounds = array<i64: 1, 160>}, {transform_indices = @transform_4, window_bounds = array<i64: 192, 160>}]} {
    %c0 = arith.constant 0 : index
    %c0_0 = arith.constant 0 : index
    %0 = vector.load %arg1[%c0, %c0_0] : memref<192x96xf32, #tpu.memory_space<vmem>>, vector<192x96xf32>
    %c0_1 = arith.constant 0 : index
    %c0_2 = arith.constant 0 : index
    %1 = vector.load %arg3[%c0_1, %c0_2] : memref<96x160xf32, #tpu.memory_space<vmem>>, vector<96x160xf32>
    %cst = arith.constant dense<0.000000e+00> : vector<192x160xf32>
    %2 = tpu.matmul %0, %1, %cst {dimension_numbers = #tpu.dot_dimension_numbers<[1], [0], [0], [1], [0, 0, 1, 1], [], []>} : vector<192x96xf32>, vector<96x160xf32>, vector<192x160xf32> -> vector<192x160xf32>
    %c0_3 = arith.constant 0 : index
    %c0_4 = arith.constant 0 : index
    %3 = vector.load %arg2[%c0_3, %c0_4] : memref<192x160xf32, #tpu.memory_space<vmem>>, vector<192x160xf32>
    %c0_5 = arith.constant 0 : index
    %c0_6 = arith.constant 0 : index
    %4 = vector.load %arg4[%c0_5, %c0_6] : memref<1x160xf32, #tpu.memory_space<vmem>>, vector<1x160xf32>
    %5 = vector.broadcast %4 : vector<1x160xf32> to vector<192x160xf32>
    %6 = arith.addf %3, %5 : vector<192x160xf32>
    %7 = arith.addf %6, %2 : vector<192x160xf32>
    %cst_7 = arith.constant 0.000000e+00 : f32
    %8 = vector.broadcast %cst_7 : f32 to vector<192x160xf32>
    %9 = arith.maximumf %7, %8 : vector<192x160xf32>
    %c0_8 = arith.constant 0 : index
    %c0_9 = arith.constant 0 : index
    %10 = vector.load %arg5[%c0_8, %c0_9] : memref<192x160xf32, #tpu.memory_space<vmem>>, vector<192x160xf32>
    tpu.vector_store %arg5[%c0_8, %c0_9], %9 {strides = array<i32>} : memref<192x160xf32, #tpu.memory_space<vmem>>, vector<192x160xf32>,
    return
  }
  func.func @transform_0(%arg0: i32) -> (i32, i32) {
    %c0_i32 = arith.constant 0 : i32
    %c0_i32_0 = arith.constant 0 : i32
    return %arg0, %c0_i32 : i32, i32
  }
  func.func @transform_1(%arg0: i32) -> (i32, i32) {
    %c0_i32 = arith.constant 0 : i32
    %c0_i32_0 = arith.constant 0 : i32
    return %arg0, %c0_i32 : i32, i32
  }
  func.func @transform_2(%arg0: i32) -> (i32, i32) {
    %c0_i32 = arith.constant 0 : i32
    %c0_i32_0 = arith.constant 0 : i32
    %c0_i32_1 = arith.constant 0 : i32
    return %c0_i32, %c0_i32_0 : i32, i32
  }
  func.func @transform_3(%arg0: i32) -> (i32, i32) {
    %c0_i32 = arith.constant 0 : i32
    %c0_i32_0 = arith.constant 0 : i32
    %c0_i32_1 = arith.constant 0 : i32
    return %c0_i32, %c0_i32_0 : i32, i32
  }
  func.func @transform_4(%arg0: i32) -> (i32, i32) {
    %c0_i32 = arith.constant 0 : i32
    %c0_i32_0 = arith.constant 0 : i32
    return %arg0, %c0_i32 : i32, i32
  }
}

</mosaic_0001>

<bundles_post_ra>
// kernel: tpu_custom_call.1
= control target key start
LH: loop header
LB: loop body
LE: loop exit
PB: predicated region body
PF: predicated region fallthrough
CT: control target
= control target key end

     0   :  { %v653_v3 = vmov 0.0   ;;  %vm65_vm0 = vcmask 785408   ;;  %v397_v49 = vlaneseq  ;;  %vm552_vm1 = vcmask 261120   ;;  %s1238_s2 = inlined_call_operand.vmem [shape: f32[96,160], index: 2, kind: input, shape index: {}]   ;;  %s1239_s0 = inlined_call_operand.vmem [shape: f32[192,96], index: 0, kind: input, shape index: {}]   ;;  %s1240_s3 = inlined_call_operand.vmem [shape: f32[1,160], index: 3, kind: input, shape index: {}]   ;;  %s1241_s1 = inlined_call_operand.vmem [shape: f32[192,160], index: 1, kind: input, shape index: {}]   ;;  %s1242_s4 = inlined_call_operand.vmem [shape: f32[192,160], index: 4, kind: output, shape index: {}]  }
   0x1   :  { %v64_v0 = vld [vmem:[%s1238_s2 + $0xb8] sm:$0xff]  ;;  %v63_v1 = vld [vmem:[%s1238_s2 + $0xb0] sm:$0xff]  ;;  %v62_v2 = vld [vmem:[%s1238_s2 + $0xa8] sm:$0xff]  ;;  %202 = vmatprep.mubr.f32.mxu0 %v653_v3  ;;  %274 = vmatprep.mubr.f32.mxu1 %v653_v3 }
   0x2   :  { %146 = vmatprep.subr.mxu0 %v64_v0  ;;  %628 = vmatprep.subr.mxu1 %v64_v0  ;;  %v61_v4 = vld [vmem:[%s1238_s2 + $0xa0] sm:$0xff]  ;;  %v60_v5 = vld [vmem:[%s1238_s2 + $0x98] sm:$0xff]  ;;  %v59_v6 = vld [vmem:[%s1238_s2 + $0x90] sm:$0xff]  ;;  %v398_v50 = vshrl.u32 %v397_v49, 7 }
   0x3   :  { %147 = vmatpush1.msra.mxu0 %v63_v1  ;;  %640 = vmatpush1.msra.mxu1 %v63_v1  ;;  %v58_v7 = vld [vmem:[%s1238_s2 + $0x88] sm:$0xff]  ;;  %v57_v8 = vld [vmem:[%s1238_s2 + $0x80] sm:$0xff]  ;;  %v56_v9 = vld [vmem:[%s1238_s2 + $0x78] sm:$0xff] }
   0x4   :  { %148 = vmatprep.subr.mxu0 %v62_v2  ;;  %629 = vmatprep.subr.mxu1 %v62_v2  ;;  %v55_v10 = vld [vmem:[%s1238_s2 + $0x70] sm:$0xff]  ;;  %v54_v11 = vld [vmem:[%s1238_s2 + $0x68] sm:$0xff]  ;;  %v53_v12 = vld [vmem:[%s1238_s2 + $0x60] sm:$0xff]  ;;  %v399_v51 = vsub.s32 0, %v398_v50  ;;  %v403_v53 = vsub.s32 1, %v398_v50 }
   0x5   :  { %149 = vmatpush1.msra.mxu0 %v61_v4  ;;  %641 = vmatpush1.msra.mxu1 %v61_v4  ;;  %v52_v13 = vld [vmem:[%s1238_s2 + $0x58] sm:$0xff]  ;;  %v51_v14 = vld [vmem:[%s1238_s2 + $0x50] sm:$0xff]  ;;  %v50_v15 = vld [vmem:[%s1238_s2 + $0x48] sm:$0xff] }
   0x6   :  { %150 = vmatprep.subr.mxu0 %v60_v5  ;;  %630 = vmatprep.subr.mxu1 %v60_v5  ;;  %v49_v16 = vld [vmem:[%s1238_s2 + $0x40] sm:$0xff]  ;;  %v48_v17 = vld [vmem:[%s1238_s2 + $0x38] sm:$0xff]  ;;  %v47_v18 = vld [vmem:[%s1238_s2 + $0x30] sm:$0xff] }
   0x7   :  { %151 = vmatpush1.msra.mxu0 %v59_v6  ;;  %642 = vmatpush1.msra.mxu1 %v59_v6  ;;  %v46_v19 = vld [vmem:[%s1238_s2 + $0x28] sm:$0xff]  ;;  %v45_v20 = vld [vmem:[%s1238_s2 + $0x20] sm:$0xff]  ;;  %v44_v21 = vld [vmem:[%s1238_s2 + $0x18] sm:$0xff] }
   0x8   :  { %152 = vmatprep.subr.mxu0 %v58_v7  ;;  %631 = vmatprep.subr.mxu1 %v58_v7  ;;  %v43_v22 = vld [vmem:[%s1238_s2 + $0x10] sm:$0xff]  ;;  %v42_v23 = vld [vmem:[%s1238_s2 + $0x8] sm:$0xff]  ;;  %v41_v24 = vld [vmem:[%s1238_s2] sm:$0xff] }
   0x9   :  { %153 = vmatpush1.msra.mxu0 %v57_v8  ;;  %643 = vmatpush1.msra.mxu1 %v57_v8  ;;  %v17_v25 = vld [vmem:[%s1239_s0] sm:$0xff]  ;;  %v18_v27 = vld [vmem:[%s1239_s0 + $0x8] sm:$0xff]  ;;  %v19_v29 = vld [vmem:[%s1239_s0 + $0x10] sm:$0xff] }
   0xa   :  { %154 = vmatprep.subr.mxu0 %v56_v9  ;;  %632 = vmatprep.subr.mxu1 %v56_v9  ;;  %v29_v26 = vld [vmem:[%s1239_s0 + $0x60] sm:$0xff]  ;;  %v30_v28 = vld [vmem:[%s1239_s0 + $0x68] sm:$0xff]  ;;  %v31_v30 = vld [vmem:[%s1239_s0 + $0x70] sm:$0xff] }
   0xb   :  { %155 = vmatpush1.msra.mxu0 %v55_v10  ;;  %644 = vmatpush1.msra.mxu1 %v55_v10  ;;  %v20_v31 = vld [vmem:[%s1239_s0 + $0x18] sm:$0xff]  ;;  %v21_v33 = vld [vmem:[%s1239_s0 + $0x20] sm:$0xff]  ;;  %v22_v35 = vld [vmem:[%s1239_s0 + $0x28] sm:$0xff] }
   0xc   :  { %156 = vmatprep.subr.mxu0 %v54_v11  ;;  %633 = vmatprep.subr.mxu1 %v54_v11  ;;  %v32_v32 = vld [vmem:[%s1239_s0 + $0x78] sm:$0xff]  ;;  %v33_v34 = vld [vmem:[%s1239_s0 + $0x80] sm:$0xff]  ;;  %v34_v36 = vld [vmem:[%s1239_s0 + $0x88] sm:$0xff] }
   0xd   :  { %157 = vmatpush1.msra.mxu0 %v53_v12  ;;  %645 = vmatpush1.msra.mxu1 %v53_v12  ;;  %v23_v37 = vld [vmem:[%s1239_s0 + $0x30] sm:$0xff]  ;;  %v24_v39 = vld [vmem:[%s1239_s0 + $0x38] sm:$0xff]  ;;  %v25_v41 = vld [vmem:[%s1239_s0 + $0x40] sm:$0xff] }
   0xe   :  { %158 = vmatprep.subr.mxu0 %v52_v13  ;;  %634 = vmatprep.subr.mxu1 %v52_v13  ;;  %v35_v38 = vld [vmem:[%s1239_s0 + $0x90] sm:$0xff]  ;;  %v36_v40 = vld [vmem:[%s1239_s0 + $0x98] sm:$0xff]  ;;  %v37_v42 = vld [vmem:[%s1239_s0 + $0xa0] sm:$0xff] }
   0xf   :  { %159 = vmatpush1.msra.mxu0 %v51_v14  ;;  %646 = vmatpush1.msra.mxu1 %v51_v14  ;;  %v26_v43 = vld [vmem:[%s1239_s0 + $0x48] sm:$0xff]  ;;  %v27_v45 = vld [vmem:[%s1239_s0 + $0x50] sm:$0xff]  ;;  %v28_v47 = vld [vmem:[%s1239_s0 + $0x58] sm:$0xff] }
  0x10   :  { %160 = vmatprep.subr.mxu0 %v50_v15  ;;  %635 = vmatprep.subr.mxu1 %v50_v15  ;;  %v38_v44 = vld [vmem:[%s1239_s0 + $0xa8] sm:$0xff]  ;;  %v39_v46 = vld [vmem:[%s1239_s0 + $0xb0] sm:$0xff]  ;;  %v40_v48 = vld [vmem:[%s1239_s0 + $0xb8] sm:$0xff] }
  0x11   :  { %161 = vmatpush1.msra.mxu0 %v49_v16  ;;  %647 = vmatpush1.msra.mxu1 %v49_v16  ;;  %v395_v52 = vld [vmem:[%s1240_s3] sm:$0x3]  ;;  %v348_v58 = vld [vmem:[%s1241_s1 + $0x8] sm:$0xff]  ;;  %v349_v62 = vld [vmem:[%s1241_s1 + $0x10] sm:$0xff] }
  0x12   :  { %162 = vmatprep.subr.mxu0 %v48_v17  ;;  %636 = vmatprep.subr.mxu1 %v48_v17  ;;  %v874_v54 = vrot.slane %v395_v52, %v399_v51  ;;  %v347_v55 = vld [vmem:[%s1241_s1] sm:$0xff]  ;;  %v882_v57 = vrot.slane %v395_v52, %v403_v53  ;;  %v372_v59 = vld [vmem:[%s1241_s1 + $0xc8] sm:$0xff]  ;;  %v373_v63 = vld [vmem:[%s1241_s1 + $0xd0] sm:$0xff] }
  0x13   :  { %163 = vmatpush1.msra.mxu0 %v47_v18  ;;  %648 = vmatpush1.msra.mxu1 %v47_v18  ;;  %v371_v56 = vld [vmem:[%s1241_s1 + $0xc0] sm:$0xff]  ;;  %v350_v2 = vld [vmem:[%s1241_s1 + $0x18] sm:$0xff] }
  0x14   :  { %164 = vmatprep.subr.mxu0 %v46_v19  ;;  %637 = vmatprep.subr.mxu1 %v46_v19  ;;  %v407_v60 = vadd.f32 %v874_v54, %v347_v55  ;;  %v431_v61 = vadd.f32 %v874_v54, %v371_v56  ;;  %v408_v0 = vadd.f32 %v882_v57, %v348_v58  ;;  %v351_v10 = vld [vmem:[%s1241_s1 + $0x20] sm:$0xff] }
  0x15   :  { %165 = vmatpush1.msra.mxu0 %v45_v20  ;;  %649 = vmatpush1.msra.mxu1 %v45_v20  ;;  %v432_v1 = vadd.f32 %v882_v57, %v372_v59  ;;  %v409_v8 = vadd.f32 %v874_v54, %v349_v62  ;;  %v433_v9 = vadd.f32 %v874_v54, %v373_v63  ;;  %v375_v11 = vld [vmem:[%s1241_s1 + $0xe0] sm:$0xff]  ;;  %v352_v20 = vld [vmem:[%s1241_s1 + $0x28] sm:$0xff] }
  0x16   :  { %166 = vmatprep.subr.mxu0 %v44_v21  ;;  %638 = vmatprep.subr.mxu1 %v44_v21  ;;  %v410_v14 = vadd.f32 %v882_v57, %v350_v2  ;;  %v376_v21 = vld [vmem:[%s1241_s1 + $0xe8] sm:$0xff]  ;;  %v355_v50 = vld [vmem:[%s1241_s1 + $0x40] sm:$0xff] }
  0x17   :  { %167 = vmatpush1.msra.mxu0 %v43_v22  ;;  %650 = vmatpush1.msra.mxu1 %v43_v22  ;;  %v379_v51 = vld [vmem:[%s1241_s1 + $0x100] sm:$0xff]  ;;  %v356_v62 = vld [vmem:[%s1241_s1 + $0x48] sm:$0xff]  ;;  %v415_v2 = vadd.f32 %v874_v54, %v355_v50 }
  0x18   :  { %168 = vmatprep.subr.mxu0 %v42_v23  ;;  %639 = vmatprep.subr.mxu1 %v42_v23  ;;  %v380_v63 = vld [vmem:[%s1241_s1 + $0x108] sm:$0xff] }
  0x19   :  { %169 = vmatpush1.msra.mxu0 %v41_v24  ;;  %651 = vmatpush1.msra.mxu1 %v41_v24  ;;  %v411_v24 = vadd.f32 %v874_v54, %v351_v10 }
  0x1a   :  { %604 = vmatmul.mubr.msk.f32.vlgmr.msra.gmra.mxu0 %vm65_vm0, %v17_v25  ;;  %616 = vmatmul.mubr.msk.f32.vlgmr.msra.gmra.mxu1 %vm65_vm0, %v29_v26  ;;  %v435_v25 = vadd.f32 %v874_v54, %v375_v11 }
  0x1b   :  { %208 = vmatprep.mubr.f32.mxu0 %v653_v3  ;;  %280 = vmatprep.mubr.f32.mxu1 %v653_v3 }
  0x1e   :  { %605 = vmatmul.mubr.msk.f32.gmra.mxu0 %vm65_vm0, %v18_v27  ;;  %617 = vmatmul.mubr.msk.f32.gmra.mxu1 %vm65_vm0, %v30_v28 }
  0x1f   :  { %214 = vmatprep.mubr.f32.mxu0 %v653_v3  ;;  %286 = vmatprep.mubr.f32.mxu1 %v653_v3 }
  0x22   :  { %606 = vmatmul.mubr.msk.f32.gmra.mxu0 %vm65_vm0, %v19_v29  ;;  %618 = vmatmul.mubr.msk.f32.gmra.mxu1 %vm65_vm0, %v31_v30  ;;  %v353_v30 = vld [vmem:[%s1241_s1 + $0x30] sm:$0xff] }
  0x23   :  { %220 = vmatprep.mubr.f32.mxu0 %v653_v3  ;;  %292 = vmatprep.mubr.f32.mxu1 %v653_v3 }
  0x26   :  { %607 = vmatmul.mubr.msk.f32.gmra.mxu0 %vm65_vm0, %v20_v31  ;;  %619 = vmatmul.mubr.msk.f32.gmra.mxu1 %vm65_vm0, %v32_v32  ;;  %v377_v31 = vld [vmem:[%s1241_s1 + $0xf0] sm:$0xff] }
  0x27   :  { %226 = vmatprep.mubr.f32.mxu0 %v653_v3  ;;  %298 = vmatprep.mubr.f32.mxu1 %v653_v3 }
  0x2a   :  { %608 = vmatmul.mubr.msk.f32.gmra.mxu0 %vm65_vm0, %v21_v33  ;;  %620 = vmatmul.mubr.msk.f32.gmra.mxu1 %vm65_vm0, %v33_v34  ;;  %v412_v34 = vadd.f32 %v882_v57, %v352_v20 }
  0x2b   :  { %232 = vmatprep.mubr.f32.mxu0 %v653_v3  ;;  %304 = vmatprep.mubr.f32.mxu1 %v653_v3 }
  0x2e   :  { %609 = vmatmul.mubr.msk.f32.gmra.mxu0 %vm65_vm0, %v22_v35  ;;  %621 = vmatmul.mubr.msk.f32.gmra.mxu1 %vm65_vm0, %v34_v36  ;;  %v436_v35 = vadd.f32 %v882_v57, %v376_v21 }
  0x2f   :  { %238 = vmatprep.mubr.f32.mxu0 %v653_v3  ;;  %310 = vmatprep.mubr.f32.mxu1 %v653_v3 }
  0x32   :  { %610 = vmatmul.mubr.msk.f32.gmra.mxu0 %vm65_vm0, %v23_v37  ;;  %622 = vmatmul.mubr.msk.f32.gmra.mxu1 %vm65_vm0, %v35_v38 }
  0x33   :  { %244 = vmatprep.mubr.f32.mxu0 %v653_v3  ;;  %316 = vmatprep.mubr.f32.mxu1 %v653_v3 }
  0x36   :  { %611 = vmatmul.mubr.msk.f32.gmra.mxu0 %vm65_vm0, %v24_v39  ;;  %623 = vmatmul.mubr.msk.f32.gmra.mxu1 %vm65_vm0, %v36_v40  ;;  %v354_v40 = vld [vmem:[%s1241_s1 + $0x38] sm:$0xff] }
  0x37   :  { %250 = vmatprep.mubr.f32.mxu0 %v653_v3  ;;  %322 = vmatprep.mubr.f32.mxu1 %v653_v3  ;;  %v414_v55 = vadd.f32 %v882_v57, %v354_v40 }
  0x3a   :  { %612 = vmatmul.mubr.msk.f32.gmra.mxu0 %vm65_vm0, %v25_v41  ;;  %624 = vmatmul.mubr.msk.f32.gmra.mxu1 %vm65_vm0, %v37_v42  ;;  %v378_v41 = vld [vmem:[%s1241_s1 + $0xf8] sm:$0xff] }
  0x3b   :  { %256 = vmatprep.mubr.f32.mxu0 %v653_v3  ;;  %328 = vmatprep.mubr.f32.mxu1 %v653_v3  ;;  %v438_v56 = vadd.f32 %v882_v57, %v378_v41 }
  0x3e   :  { %613 = vmatmul.mubr.msk.f32.gmra.mxu0 %vm65_vm0, %v26_v43  ;;  %625 = vmatmul.mubr.msk.f32.gmra.mxu1 %vm65_vm0, %v38_v44  ;;  %v413_v44 = vadd.f32 %v874_v54, %v353_v30 }
  0x3f   :  { %262 = vmatprep.mubr.f32.mxu0 %v653_v3  ;;  %334 = vmatprep.mubr.f32.mxu1 %v653_v3 }
  0x42   :  { %614 = vmatmul.mubr.msk.f32.gmra.mxu0 %vm65_vm0, %v27_v45  ;;  %626 = vmatmul.mubr.msk.f32.gmra.mxu1 %vm65_vm0, %v39_v46  ;;  %v437_v45 = vadd.f32 %v874_v54, %v377_v31 }
  0x43   :  { %268 = vmatprep.mubr.f32.mxu0 %v653_v3  ;;  %340 = vmatprep.mubr.f32.mxu1 %v653_v3  ;;  %v374_v3 = vld [vmem:[%s1241_s1 + $0xd8] sm:$0xff] }
  0x44   :  { %v434_v15 = vadd.f32 %v882_v57, %v374_v3  ;;  %v439_v3 = vadd.f32 %v874_v54, %v379_v51 }
  0x46   :  { %615 = vmatmul.mubr.msk.f32.gmra.mxu0 %vm65_vm0, %v28_v47  ;;  %627 = vmatmul.mubr.msk.f32.gmra.mxu1 %vm65_vm0, %v40_v48 }
  0xda   :  { %v204_v4 = vpop.f32.mrf.mxu0  ;;  %v276_v5 = vpop.f32.mrf.mxu1 }
  0xdb   :  { %v455_v6 = vadd.f32 %v407_v60, %v204_v4  ;;  %v479_v7 = vadd.f32 %v431_v61, %v276_v5 }
  0xdc   :  { %v206_v12 = vpop.f32.mrf.mxu0  ;;  %v278_v13 = vpop.f32.mrf.mxu1 }
  0xdd   :  { %v503_v16 = vmax.f32 %v455_v6, 0.0  ;;  %v527_v17 = vmax.f32 %v479_v7, 0.0  ;;  %v456_v18 = vadd.f32 %v408_v0, %v206_v12  ;;  %v480_v19 = vadd.f32 %v432_v1, %v278_v13 }
  0xde   :  { %v210_v22 = vpop.f32.mrf.mxu0  ;;  %v282_v23 = vpop.f32.mrf.mxu1  ;;  %v416_v12 = vadd.f32 %v882_v57, %v356_v62  ;;  %v440_v13 = vadd.f32 %v882_v57, %v380_v63 }
  0xdf   :  { %551 = vst [vmem:[%s1242_s4] sm:$0xff] %v503_v16  ;;  %576 = vst [vmem:[%s1242_s4 + $0xc0] sm:$0xff] %v527_v17  ;;  %v504_v26 = vmax.f32 %v456_v18, 0.0  ;;  %v528_v27 = vmax.f32 %v480_v19, 0.0  ;;  %v457_v28 = vadd.f32 %v409_v8, %v210_v22  ;;  %v481_v29 = vadd.f32 %v433_v9, %v282_v23  ;;  %v357_v8 = vld [vmem:[%s1241_s1 + $0x50] sm:$0xff]  ;;  %v358_v18 = vld [vmem:[%s1241_s1 + $0x58] sm:$0xff] }
  0xe0   :  { %v212_v32 = vpop.f32.mrf.mxu0  ;;  %v284_v33 = vpop.f32.mrf.mxu1  ;;  %v381_v9 = vld [vmem:[%s1241_s1 + $0x110] sm:$0xff]  ;;  %v382_v19 = vld [vmem:[%s1241_s1 + $0x118] sm:$0xff]  ;;  %v417_v22 = vadd.f32 %v874_v54, %v357_v8 }
  0xe1   :  { %553 = vst.msk [vmem:[%s1242_s4 + $0x8] sm:$0xff] %vm552_vm1, %v504_v26  ;;  %577 = vst.msk [vmem:[%s1242_s4 + $0xc8] sm:$0xff] %vm552_vm1, %v528_v27  ;;  %v505_v36 = vmax.f32 %v457_v28, 0.0  ;;  %v529_v37 = vmax.f32 %v481_v29, 0.0  ;;  %v458_v38 = vadd.f32 %v410_v14, %v212_v32  ;;  %v482_v39 = vadd.f32 %v434_v15, %v284_v33  ;;  %v359_v28 = vld [vmem:[%s1241_s1 + $0x60] sm:$0xff] }
  0xe2   :  { %v216_v42 = vpop.f32.mrf.mxu0  ;;  %v288_v43 = vpop.f32.mrf.mxu1  ;;  %v441_v23 = vadd.f32 %v874_v54, %v381_v9  ;;  %v383_v29 = vld [vmem:[%s1241_s1 + $0x120] sm:$0xff]  ;;  %v418_v32 = vadd.f32 %v882_v57, %v358_v18  ;;  %v442_v33 = vadd.f32 %v882_v57, %v382_v19 }
  0xe3   :  { %554 = vst [vmem:[%s1242_s4 + $0x10] sm:$0xff] %v505_v36  ;;  %578 = vst [vmem:[%s1242_s4 + $0xd0] sm:$0xff] %v529_v37  ;;  %v506_v46 = vmax.f32 %v458_v38, 0.0  ;;  %v530_v47 = vmax.f32 %v482_v39, 0.0  ;;  %v459_v48 = vadd.f32 %v411_v24, %v216_v42  ;;  %v483_v49 = vadd.f32 %v435_v25, %v288_v43  ;;  %v360_v38 = vld [vmem:[%s1241_s1 + $0x68] sm:$0xff] }
  0xe4   :  { %v218_v52 = vpop.f32.mrf.mxu0  ;;  %v290_v53 = vpop.f32.mrf.mxu1  ;;  %v384_v39 = vld [vmem:[%s1241_s1 + $0x128] sm:$0xff]  ;;  %v419_v42 = vadd.f32 %v874_v54, %v359_v28  ;;  %v443_v43 = vadd.f32 %v874_v54, %v383_v29 }
  0xe5   :  { %555 = vst.msk [vmem:[%s1242_s4 + $0x18] sm:$0xff] %vm552_vm1, %v506_v46  ;;  %579 = vst.msk [vmem:[%s1242_s4 + $0xd8] sm:$0xff] %vm552_vm1, %v530_v47  ;;  %v507_v58 = vmax.f32 %v459_v48, 0.0  ;;  %v531_v59 = vmax.f32 %v483_v49, 0.0  ;;  %v460_v60 = vadd.f32 %v412_v34, %v218_v52  ;;  %v484_v61 = vadd.f32 %v436_v35, %v290_v53  ;;  %v361_v48 = vld [vmem:[%s1241_s1 + $0x70] sm:$0xff] }
  0xe6   :  { %v222_v0 = vpop.f32.mrf.mxu0  ;;  %v294_v1 = vpop.f32.mrf.mxu1  ;;  %v385_v49 = vld [vmem:[%s1241_s1 + $0x130] sm:$0xff]  ;;  %v420_v52 = vadd.f32 %v882_v57, %v360_v38  ;;  %v444_v53 = vadd.f32 %v882_v57, %v384_v39 }
  0xe7   :  { %556 = vst [vmem:[%s1242_s4 + $0x20] sm:$0xff] %v507_v58  ;;  %580 = vst [vmem:[%s1242_s4 + $0xe0] sm:$0xff] %v531_v59  ;;  %v508_v4 = vmax.f32 %v460_v60, 0.0  ;;  %v532_v5 = vmax.f32 %v484_v61, 0.0  ;;  %v461_v6 = vadd.f32 %v413_v44, %v222_v0  ;;  %v485_v7 = vadd.f32 %v437_v45, %v294_v1  ;;  %v362_v60 = vld [vmem:[%s1241_s1 + $0x78] sm:$0xff] }
  0xe8   :  { %v224_v10 = vpop.f32.mrf.mxu0  ;;  %v296_v11 = vpop.f32.mrf.mxu1  ;;  %v386_v61 = vld [vmem:[%s1241_s1 + $0x138] sm:$0xff]  ;;  %v421_v0 = vadd.f32 %v874_v54, %v361_v48  ;;  %v445_v1 = vadd.f32 %v874_v54, %v385_v49 }
  0xe9   :  { %557 = vst.msk [vmem:[%s1242_s4 + $0x28] sm:$0xff] %vm552_vm1, %v508_v4  ;;  %581 = vst.msk [vmem:[%s1242_s4 + $0xe8] sm:$0xff] %vm552_vm1, %v532_v5  ;;  %v509_v14 = vmax.f32 %v461_v6, 0.0  ;;  %v533_v15 = vmax.f32 %v485_v7, 0.0  ;;  %v462_v16 = vadd.f32 %v414_v55, %v224_v10  ;;  %v486_v17 = vadd.f32 %v438_v56, %v296_v11  ;;  %v363_v6 = vld [vmem:[%s1241_s1 + $0x80] sm:$0xff] }
  0xea   :  { %v228_v20 = vpop.f32.mrf.mxu0  ;;  %v300_v21 = vpop.f32.mrf.mxu1  ;;  %v387_v7 = vld [vmem:[%s1241_s1 + $0x140] sm:$0xff]  ;;  %v422_v10 = vadd.f32 %v882_v57, %v362_v60  ;;  %v446_v11 = vadd.f32 %v882_v57, %v386_v61 }
  0xeb   :  { %558 = vst [vmem:[%s1242_s4 + $0x30] sm:$0xff] %v509_v14  ;;  %582 = vst [vmem:[%s1242_s4 + $0xf0] sm:$0xff] %v533_v15  ;;  %v510_v24 = vmax.f32 %v462_v16, 0.0  ;;  %v534_v25 = vmax.f32 %v486_v17, 0.0  ;;  %v463_v26 = vadd.f32 %v415_v2, %v228_v20  ;;  %v487_v27 = vadd.f32 %v439_v3, %v300_v21  ;;  %v364_v16 = vld [vmem:[%s1241_s1 + $0x88] sm:$0xff] }
  0xec   :  { %v230_v30 = vpop.f32.mrf.mxu0  ;;  %v302_v31 = vpop.f32.mrf.mxu1  ;;  %v388_v17 = vld [vmem:[%s1241_s1 + $0x148] sm:$0xff]  ;;  %v423_v20 = vadd.f32 %v874_v54, %v363_v6  ;;  %v447_v21 = vadd.f32 %v874_v54, %v387_v7 }
  0xed   :  { %559 = vst.msk [vmem:[%s1242_s4 + $0x38] sm:$0xff] %vm552_vm1, %v510_v24  ;;  %583 = vst.msk [vmem:[%s1242_s4 + $0xf8] sm:$0xff] %vm552_vm1, %v534_v25  ;;  %v511_v34 = vmax.f32 %v463_v26, 0.0  ;;  %v535_v35 = vmax.f32 %v487_v27, 0.0  ;;  %v464_v36 = vadd.f32 %v416_v12, %v230_v30  ;;  %v488_v37 = vadd.f32 %v440_v13, %v302_v31  ;;  %v365_v26 = vld [vmem:[%s1241_s1 + $0x90] sm:$0xff] }
  0xee   :  { %v234_v40 = vpop.f32.mrf.mxu0  ;;  %v306_v41 = vpop.f32.mrf.mxu1  ;;  %v389_v27 = vld [vmem:[%s1241_s1 + $0x150] sm:$0xff]  ;;  %v424_v30 = vadd.f32 %v882_v57, %v364_v16  ;;  %v448_v31 = vadd.f32 %v882_v57, %v388_v17 }
  0xef   :  { %560 = vst [vmem:[%s1242_s4 + $0x40] sm:$0xff] %v511_v34  ;;  %584 = vst [vmem:[%s1242_s4 + $0x100] sm:$0xff] %v535_v35  ;;  %v512_v44 = vmax.f32 %v464_v36, 0.0  ;;  %v536_v45 = vmax.f32 %v488_v37, 0.0  ;;  %v465_v46 = vadd.f32 %v417_v22, %v234_v40  ;;  %v489_v47 = vadd.f32 %v441_v23, %v306_v41  ;;  %v366_v36 = vld [vmem:[%s1241_s1 + $0x98] sm:$0xff] }
  0xf0   :  { %v236_v50 = vpop.f32.mrf.mxu0  ;;  %v308_v51 = vpop.f32.mrf.mxu1  ;;  %v390_v37 = vld [vmem:[%s1241_s1 + $0x158] sm:$0xff]  ;;  %v425_v40 = vadd.f32 %v874_v54, %v365_v26  ;;  %v449_v41 = vadd.f32 %v874_v54, %v389_v27 }
  0xf1   :  { %561 = vst.msk [vmem:[%s1242_s4 + $0x48] sm:$0xff] %vm552_vm1, %v512_v44  ;;  %585 = vst.msk [vmem:[%s1242_s4 + $0x108] sm:$0xff] %vm552_vm1, %v536_v45  ;;  %v513_v55 = vmax.f32 %v465_v46, 0.0  ;;  %v537_v56 = vmax.f32 %v489_v47, 0.0  ;;  %v466_v58 = vadd.f32 %v418_v32, %v236_v50  ;;  %v490_v59 = vadd.f32 %v442_v33, %v308_v51  ;;  %v367_v46 = vld [vmem:[%s1241_s1 + $0xa0] sm:$0xff] }
  0xf2   :  { %v240_v62 = vpop.f32.mrf.mxu0  ;;  %v312_v63 = vpop.f32.mrf.mxu1  ;;  %v391_v47 = vld [vmem:[%s1241_s1 + $0x160] sm:$0xff]  ;;  %v426_v50 = vadd.f32 %v882_v57, %v366_v36  ;;  %v450_v51 = vadd.f32 %v882_v57, %v390_v37 }
  0xf3   :  { %562 = vst [vmem:[%s1242_s4 + $0x50] sm:$0xff] %v513_v55  ;;  %586 = vst [vmem:[%s1242_s4 + $0x110] sm:$0xff] %v537_v56  ;;  %v514_v2 = vmax.f32 %v466_v58, 0.0  ;;  %v538_v3 = vmax.f32 %v490_v59, 0.0  ;;  %v467_v4 = vadd.f32 %v419_v42, %v240_v62  ;;  %v491_v5 = vadd.f32 %v443_v43, %v312_v63  ;;  %v368_v58 = vld [vmem:[%s1241_s1 + $0xa8] sm:$0xff] }
  0xf4   :  { %v242_v8 = vpop.f32.mrf.mxu0  ;;  %v314_v9 = vpop.f32.mrf.mxu1  ;;  %v392_v59 = vld [vmem:[%s1241_s1 + $0x168] sm:$0xff]  ;;  %v427_v62 = vadd.f32 %v874_v54, %v367_v46  ;;  %v451_v63 = vadd.f32 %v874_v54, %v391_v47 }
  0xf5   :  { %563 = vst.msk [vmem:[%s1242_s4 + $0x58] sm:$0xff] %vm552_vm1, %v514_v2  ;;  %587 = vst.msk [vmem:[%s1242_s4 + $0x118] sm:$0xff] %vm552_vm1, %v538_v3  ;;  %v515_v12 = vmax.f32 %v467_v4, 0.0  ;;  %v539_v13 = vmax.f32 %v491_v5, 0.0  ;;  %v468_v14 = vadd.f32 %v420_v52, %v242_v8  ;;  %v492_v15 = vadd.f32 %v444_v53, %v314_v9  ;;  %v369_v4 = vld [vmem:[%s1241_s1 + $0xb0] sm:$0xff] }
  0xf6   :  { %v246_v18 = vpop.f32.mrf.mxu0  ;;  %v318_v19 = vpop.f32.mrf.mxu1  ;;  %v393_v5 = vld [vmem:[%s1241_s1 + $0x170] sm:$0xff]  ;;  %v428_v8 = vadd.f32 %v882_v57, %v368_v58  ;;  %v452_v9 = vadd.f32 %v882_v57, %v392_v59 }
  0xf7   :  { %564 = vst [vmem:[%s1242_s4 + $0x60] sm:$0xff] %v515_v12  ;;  %588 = vst [vmem:[%s1242_s4 + $0x120] sm:$0xff] %v539_v13  ;;  %v516_v22 = vmax.f32 %v468_v14, 0.0  ;;  %v540_v23 = vmax.f32 %v492_v15, 0.0  ;;  %v469_v24 = vadd.f32 %v421_v0, %v246_v18  ;;  %v493_v25 = vadd.f32 %v445_v1, %v318_v19  ;;  %v370_v14 = vld [vmem:[%s1241_s1 + $0xb8] sm:$0xff] }
  0xf8   :  { %v248_v28 = vpop.f32.mrf.mxu0  ;;  %v320_v29 = vpop.f32.mrf.mxu1  ;;  %v394_v15 = vld [vmem:[%s1241_s1 + $0x178] sm:$0xff]  ;;  %v429_v18 = vadd.f32 %v874_v54, %v369_v4  ;;  %v453_v19 = vadd.f32 %v874_v54, %v393_v5  ;;  %v430_v26 = vadd.f32 %v882_v57, %v370_v14 }
  0xf9   :  { %565 = vst.msk [vmem:[%s1242_s4 + $0x68] sm:$0xff] %vm552_vm1, %v516_v22  ;;  %589 = vst.msk [vmem:[%s1242_s4 + $0x128] sm:$0xff] %vm552_vm1, %v540_v23  ;;  %v517_v32 = vmax.f32 %v469_v24, 0.0  ;;  %v541_v33 = vmax.f32 %v493_v25, 0.0  ;;  %v470_v34 = vadd.f32 %v422_v10, %v248_v28  ;;  %v494_v35 = vadd.f32 %v446_v11, %v320_v29 }
  0xfa   :  { %v252_v38 = vpop.f32.mrf.mxu0  ;;  %v324_v39 = vpop.f32.mrf.mxu1  ;;  %v454_v27 = vadd.f32 %v882_v57, %v394_v15 }
  0xfb   :  { %566 = vst [vmem:[%s1242_s4 + $0x70] sm:$0xff] %v517_v32  ;;  %590 = vst [vmem:[%s1242_s4 + $0x130] sm:$0xff] %v541_v33  ;;  %v518_v42 = vmax.f32 %v470_v34, 0.0  ;;  %v542_v43 = vmax.f32 %v494_v35, 0.0  ;;  %v471_v44 = vadd.f32 %v423_v20, %v252_v38  ;;  %v495_v45 = vadd.f32 %v447_v21, %v324_v39 }
  0xfc   :  { %v254_v48 = vpop.f32.mrf.mxu0  ;;  %v326_v49 = vpop.f32.mrf.mxu1 }
  0xfd   :  { %567 = vst.msk [vmem:[%s1242_s4 + $0x78] sm:$0xff] %vm552_vm1, %v518_v42  ;;  %591 = vst.msk [vmem:[%s1242_s4 + $0x138] sm:$0xff] %vm552_vm1, %v542_v43  ;;  %v519_v52 = vmax.f32 %v471_v44, 0.0  ;;  %v543_v53 = vmax.f32 %v495_v45, 0.0  ;;  %v472_v55 = vadd.f32 %v424_v30, %v254_v48  ;;  %v496_v56 = vadd.f32 %v448_v31, %v326_v49 }
  0xfe   :  { %v258_v60 = vpop.f32.mrf.mxu0  ;;  %v330_v61 = vpop.f32.mrf.mxu1 }
  0xff   :  { %568 = vst [vmem:[%s1242_s4 + $0x80] sm:$0xff] %v519_v52  ;;  %592 = vst [vmem:[%s1242_s4 + $0x140] sm:$0xff] %v543_v53  ;;  %v520_v0 = vmax.f32 %v472_v55, 0.0  ;;  %v544_v1 = vmax.f32 %v496_v56, 0.0  ;;  %v473_v2 = vadd.f32 %v425_v40, %v258_v60  ;;  %v497_v3 = vadd.f32 %v449_v41, %v330_v61 }
 0x100   :  { %v260_v6 = vpop.f32.mrf.mxu0  ;;  %v332_v7 = vpop.f32.mrf.mxu1 }
 0x101   :  { %569 = vst.msk [vmem:[%s1242_s4 + $0x88] sm:$0xff] %vm552_vm1, %v520_v0  ;;  %593 = vst.msk [vmem:[%s1242_s4 + $0x148] sm:$0xff] %vm552_vm1, %v544_v1  ;;  %v521_v10 = vmax.f32 %v473_v2, 0.0  ;;  %v545_v11 = vmax.f32 %v497_v3, 0.0  ;;  %v474_v12 = vadd.f32 %v426_v50, %v260_v6  ;;  %v498_v13 = vadd.f32 %v450_v51, %v332_v7 }
 0x102   :  { %v264_v16 = vpop.f32.mrf.mxu0  ;;  %v336_v17 = vpop.f32.mrf.mxu1 }
 0x103   :  { %570 = vst [vmem:[%s1242_s4 + $0x90] sm:$0xff] %v521_v10  ;;  %594 = vst [vmem:[%s1242_s4 + $0x150] sm:$0xff] %v545_v11  ;;  %v522_v20 = vmax.f32 %v474_v12, 0.0  ;;  %v546_v21 = vmax.f32 %v498_v13, 0.0  ;;  %v475_v22 = vadd.f32 %v427_v62, %v264_v16  ;;  %v499_v23 = vadd.f32 %v451_v63, %v336_v17 }
 0x104   :  { %v266_v24 = vpop.f32.mrf.mxu0  ;;  %v338_v25 = vpop.f32.mrf.mxu1 }
 0x105   :  { %571 = vst.msk [vmem:[%s1242_s4 + $0x98] sm:$0xff] %vm552_vm1, %v522_v20  ;;  %595 = vst.msk [vmem:[%s1242_s4 + $0x158] sm:$0xff] %vm552_vm1, %v546_v21  ;;  %v523_v54 = vmax.f32 %v475_v22, 0.0  ;;  %v547_v28 = vmax.f32 %v499_v23, 0.0  ;;  %v476_v29 = vadd.f32 %v428_v8, %v266_v24  ;;  %v500_v30 = vadd.f32 %v452_v9, %v338_v25 }
 0x106   :  { %v270_v31 = vpop.f32.mrf.mxu0  ;;  %v342_v32 = vpop.f32.mrf.mxu1 }
 0x107   :  { %572 = vst [vmem:[%s1242_s4 + $0xa0] sm:$0xff] %v523_v54  ;;  %596 = vst [vmem:[%s1242_s4 + $0x160] sm:$0xff] %v547_v28  ;;  %v524_v57 = vmax.f32 %v476_v29, 0.0  ;;  %v548_v33 = vmax.f32 %v500_v30, 0.0  ;;  %v477_v34 = vadd.f32 %v429_v18, %v270_v31  ;;  %v501_v35 = vadd.f32 %v453_v19, %v342_v32 }
 0x108   :  { %v272_v36 = vpop.f32.mrf.mxu0  ;;  %v344_v37 = vpop.f32.mrf.mxu1 }
 0x109   :  { %573 = vst.msk [vmem:[%s1242_s4 + $0xa8] sm:$0xff] %vm552_vm1, %v524_v57  ;;  %597 = vst.msk [vmem:[%s1242_s4 + $0x168] sm:$0xff] %vm552_vm1, %v548_v33  ;;  %v525_v38 = vmax.f32 %v477_v34, 0.0  ;;  %v549_v39 = vmax.f32 %v501_v35, 0.0  ;;  %v478_v40 = vadd.f32 %v430_v26, %v272_v36  ;;  %v502_v41 = vadd.f32 %v454_v27, %v344_v37 }
 0x10b   :  { %574 = vst [vmem:[%s1242_s4 + $0xb0] sm:$0xff] %v525_v38  ;;  %598 = vst [vmem:[%s1242_s4 + $0x170] sm:$0xff] %v549_v39  ;;  %v526_v42 = vmax.f32 %v478_v40, 0.0  ;;  %v550_v43 = vmax.f32 %v502_v41, 0.0 }
 0x10d   :  { %575 = vst.msk [vmem:[%s1242_s4 + $0xb8] sm:$0xff] %vm552_vm1, %v526_v42  ;;  %599 = vst.msk [vmem:[%s1242_s4 + $0x178] sm:$0xff] %vm552_vm1, %v550_v43 }

</bundles_post_ra>
